<compile_context>
chip_gen: v6e
topology: v6e:2x2x1
jax: 0.10.0
libtpu: 0.0.40
codegen_flags: <defaults>
</compile_context>

<pallas_src>
import jax
import jax.numpy as jnp
from jax.experimental import pallas as pl
from jax.experimental.pallas import tpu as pltpu


def _round_up(x: int, m: int) -> int:
    return ((x + m - 1) // m) * m


def walk_embedding_kernel(seq_ref,     # VMEM (TN, 1)  int32  flattened node ids
                          cost_ref,    # VMEM (TN, 1)  f32    flattened costs
                          table_ref,   # VMEM (num_nodes, 3E) f32 fused lookup table
                          wcost_ref,   # VMEM (1, 3E)  f32    [0 | w_cost | 0]
                          out_ref):    # VMEM (TN, 3E) f32
    ids = seq_ref[...]                                    # (TN, 1) int32
    tn = ids.shape[0]
    num_nodes = table_ref.shape[0]

    # One-hot gather on the MXU: exactly one 1.0 per row, so the gathered value
    # (including the deg/cost biases baked into the table) is exact.
    node_iota = jax.lax.broadcasted_iota(jnp.int32, (tn, num_nodes), 1)
    one_hot = (node_iota == ids).astype(jnp.float32)      # (TN, num_nodes)
    gathered = jnp.dot(one_hot, table_ref[...],
                       preferred_element_type=jnp.float32)  # (TN, 3E)

    # Cost Linear: cost * w_cost lands only in the middle E lanes (wcost_ref is
    # zero elsewhere); the cost bias is already part of every table row.
    out_ref[...] = gathered + cost_ref[...] * wcost_ref[...]


def walk_embedding(sequence, cost, degrees, node_table, w_deg, b_deg, w_cost, b_cost):
    """sequence: int32 (B, W, L); cost: (B, W, L); degrees: (num_nodes,);
    node_table: (num_nodes, E); w_*: (E, 1); b_*: (E,).
    Returns float32 (B, W, L, 3*E) == torch.cat([deg_emb, cost_emb, node_emb], -1)."""
    B, W, L = sequence.shape
    num_nodes, E = node_table.shape
    N = B * W * L

    # --- wrapper-side precompute (cheap O(num_nodes*E) XLA ops) -------------------
    deg_emb_all = (degrees.astype(jnp.float32)[:, None] * w_deg.reshape(1, E).astype(jnp.float32)
                   + b_deg.reshape(1, E).astype(jnp.float32))              # (num_nodes, E)
    fused_table = jnp.concatenate(
        [deg_emb_all,
         jnp.broadcast_to(b_cost.reshape(1, E).astype(jnp.float32), (num_nodes, E)),
         node_table.astype(jnp.float32)],
        axis=1)                                                            # (num_nodes, 3E)
    w_cost_row = jnp.concatenate(
        [jnp.zeros((1, E), jnp.float32),
         w_cost.reshape(1, E).astype(jnp.float32),
         jnp.zeros((1, E), jnp.float32)],
        axis=1)                                                            # (1, 3E)

    # --- row tiling: large tiles, pad N up to a multiple of TN --------------------
    TN = min(512, _round_up(max(N, 8), 8))
    N_pad = _round_up(N, TN)

    seq_flat = sequence.reshape(N).astype(jnp.int32)
    cost_flat = cost.reshape(N).astype(jnp.float32)
    if N_pad != N:
        seq_flat = jnp.pad(seq_flat, (0, N_pad - N))       # padded rows gather node 0
        cost_flat = jnp.pad(cost_flat, (0, N_pad - N))     # and are sliced off below
    seq_col = seq_flat.reshape(N_pad, 1)
    cost_col = cost_flat.reshape(N_pad, 1)

    out = pl.pallas_call(
        walk_embedding_kernel,
        out_shape=jax.ShapeDtypeStruct((N_pad, 3 * E), jnp.float32),
        grid=(N_pad // TN,),
        in_specs=[
            pl.BlockSpec((TN, 1), lambda i: (i, 0)),                 # sequence ids
            pl.BlockSpec((TN, 1), lambda i: (i, 0)),                 # costs
            pl.BlockSpec((num_nodes, 3 * E), lambda i: (0, 0)),      # fused table (resident)
            pl.BlockSpec((1, 3 * E), lambda i: (0, 0)),              # cost weight row
        ],
        out_specs=pl.BlockSpec((TN, 3 * E), lambda i: (i, 0)),
        compiler_params=pltpu.CompilerParams(
            dimension_semantics=("parallel",),           # disjoint tiles -> megacore OK
            vmem_limit_bytes=48 * 1024 * 1024,           # explicit budget (v7x headroom)
        ),
    )(seq_col, cost_col, fused_table, w_cost_row)

    return out[:N].reshape(B, W, L, 3 * E)


def ref_walk_embedding(sequence, cost, degrees, node_table, w_deg, b_deg, w_cost, b_cost):
    """Pure-JAX reference mirroring the PyTorch forward exactly."""
    E = node_table.shape[1]
    deg = degrees.astype(jnp.float32)[:, None]                       # (num_nodes, 1)
    deg_emb_all = deg * w_deg.reshape(1, E) + b_deg.reshape(1, E)    # Linear(1, E)
    deg_emb = deg_emb_all[sequence]                                  # gather by sequence
    cost_emb = (cost.astype(jnp.float32)[..., None] * w_cost.reshape(1, E)
                + b_cost.reshape(1, E))
    node_emb = node_table[sequence]
    return jnp.concatenate([deg_emb, cost_emb, node_emb], axis=-1)


if __name__ == "__main__":
    key = jax.random.PRNGKey(0)
    k1, k2, k3, k4, k5, k6, k7, k8 = jax.random.split(key, 8)

    B, W, L = 2, 4, 8           # batch, num_walks, len_walk
    emb_dim = 32
    num_nodes = 32

    sequence = jax.random.randint(k1, (B, W, L), 0, num_nodes, dtype=jnp.int32)
    cost = jax.random.uniform(k2, (B, W, L), dtype=jnp.float32)
    # graph.in_degrees() stand-in: deterministic synthetic integer degrees.
    degrees = jax.random.randint(k3, (num_nodes,), 0, 10).astype(jnp.float32)

    # Parameters (shapes match nn.Linear(1, E) / nn.Embedding(num_nodes, E)).
    node_table = jax.random.normal(k4, (num_nodes, emb_dim), dtype=jnp.float32)
    w_deg = 0.1 * jax.random.normal(k5, (emb_dim, 1), dtype=jnp.float32)
    b_deg = 0.1 * jax.random.normal(k6, (emb_dim,), dtype=jnp.float32)
    w_cost = 0.1 * jax.random.normal(k7, (emb_dim, 1), dtype=jnp.float32)
    b_cost = 0.1 * jax.random.normal(k8, (emb_dim,), dtype=jnp.float32)

    out = walk_embedding(sequence, cost, degrees, node_table, w_deg, b_deg, w_cost, b_cost)
    out = jax.block_until_ready(out)

    ref = ref_walk_embedding(sequence, cost, degrees, node_table, w_deg, b_deg, w_cost, b_cost)
    assert out.shape == (B, W, L, 3 * emb_dim), out.shape
    assert jnp.allclose(out, ref, atol=1e-5, rtol=1e-5), float(jnp.max(jnp.abs(out - ref)))
    print("KERNEL_OK")
</pallas_src>

<mosaic_0001>
module attributes {stable_mosaic.version = 11 : i64} {
  func.func @walk_embedding_kernel(%arg0: i32, %arg1: memref<64x1xi32, #tpu.memory_space<vmem>>, %arg2: memref<64x1xf32, #tpu.memory_space<vmem>>, %arg3: memref<32x96xf32, #tpu.memory_space<vmem>>, %arg4: memref<1x96xf32, #tpu.memory_space<vmem>>, %arg5: memref<64x96xf32, #tpu.memory_space<vmem>>) attributes {dimension_semantics = [#tpu.dimension_semantics<parallel>], iteration_bounds = array<i64: 1>, scalar_prefetch = 0 : i64, scratch_operands = 0 : i64, tpu.core_type = #tpu.core_type<tc>, window_params = [{transform_indices = @transform_0, window_bounds = array<i64: 64, 1>}, {transform_indices = @transform_1, window_bounds = array<i64: 64, 1>}, {pipeline_mode = #tpu.pipeline_mode<synchronous>, transform_indices = @transform_2, window_bounds = array<i64: 32, 96>}, {pipeline_mode = #tpu.pipeline_mode<synchronous>, transform_indices = @transform_3, window_bounds = array<i64: 1, 96>}, {transform_indices = @transform_4, window_bounds = array<i64: 64, 96>}]} {
    %c0 = arith.constant 0 : index
    %c0_0 = arith.constant 0 : index
    %0 = vector.load %arg1[%c0, %c0_0] : memref<64x1xi32, #tpu.memory_space<vmem>>, vector<64x1xi32>
    %1 = tpu.iota {dimensions = array<i32: 1>} : vector<64x32xi32>
    %2 = vector.broadcast %0 : vector<64x1xi32> to vector<64x32xi32>
    %3 = arith.cmpi eq, %1, %2 : vector<64x32xi32>
    %4 = arith.extui %3 : vector<64x32xi1> to vector<64x32xi32>
    %5 = arith.sitofp %4 : vector<64x32xi32> to vector<64x32xf32>
    %c0_1 = arith.constant 0 : index
    %c0_2 = arith.constant 0 : index
    %6 = vector.load %arg3[%c0_1, %c0_2] : memref<32x96xf32, #tpu.memory_space<vmem>>, vector<32x96xf32>
    %cst = arith.constant dense<0.000000e+00> : vector<64x96xf32>
    %7 = tpu.matmul %5, %6, %cst {dimension_numbers = #tpu.dot_dimension_numbers<[1], [0], [0], [1], [0, 0, 1, 1], [], []>} : vector<64x32xf32>, vector<32x96xf32>, vector<64x96xf32> -> vector<64x96xf32>
    %c0_3 = arith.constant 0 : index
    %c0_4 = arith.constant 0 : index
    %8 = vector.load %arg2[%c0_3, %c0_4] : memref<64x1xf32, #tpu.memory_space<vmem>>, vector<64x1xf32>
    %c0_5 = arith.constant 0 : index
    %c0_6 = arith.constant 0 : index
    %9 = vector.load %arg4[%c0_5, %c0_6] : memref<1x96xf32, #tpu.memory_space<vmem>>, vector<1x96xf32>
    %10 = vector.broadcast %8 : vector<64x1xf32> to vector<64x96xf32>
    %11 = vector.broadcast %9 : vector<1x96xf32> to vector<64x96xf32>
    %12 = arith.mulf %10, %11 : vector<64x96xf32>
    %13 = arith.addf %7, %12 : vector<64x96xf32>
    %c0_7 = arith.constant 0 : index
    %c0_8 = arith.constant 0 : index
    %14 = vector.load %arg5[%c0_7, %c0_8] : memref<64x96xf32, #tpu.memory_space<vmem>>, vector<64x96xf32>
    tpu.vector_store %arg5[%c0_7, %c0_8], %13 {strides = array<i32>} : memref<64x96xf32, #tpu.memory_space<vmem>>, vector<64x96xf32>,
    return
  }
  func.func @transform_0(%arg0: i32) -> (i32, i32) {
    %c0_i32 = arith.constant 0 : i32
    %c0_i32_0 = arith.constant 0 : i32
    return %arg0, %c0_i32 : i32, i32
  }
  func.func @transform_1(%arg0: i32) -> (i32, i32) {
    %c0_i32 = arith.constant 0 : i32
    %c0_i32_0 = arith.constant 0 : i32
    return %arg0, %c0_i32 : i32, i32
  }
  func.func @transform_2(%arg0: i32) -> (i32, i32) {
    %c0_i32 = arith.constant 0 : i32
    %c0_i32_0 = arith.constant 0 : i32
    %c0_i32_1 = arith.constant 0 : i32
    return %c0_i32, %c0_i32_0 : i32, i32
  }
  func.func @transform_3(%arg0: i32) -> (i32, i32) {
    %c0_i32 = arith.constant 0 : i32
    %c0_i32_0 = arith.constant 0 : i32
    %c0_i32_1 = arith.constant 0 : i32
    return %c0_i32, %c0_i32_0 : i32, i32
  }
  func.func @transform_4(%arg0: i32) -> (i32, i32) {
    %c0_i32 = arith.constant 0 : i32
    %c0_i32_0 = arith.constant 0 : i32
    return %arg0, %c0_i32 : i32, i32
  }
}

</mosaic_0001>

<bundles_post_ra>
// kernel: tpu_custom_call.1
= control target key start
LH: loop header
LB: loop body
LE: loop exit
PB: predicated region body
PF: predicated region fallthrough
CT: control target
= control target key end

     0   :  { %v384_v2 = vmov 0   ;;  %s496_s0 = inlined_call_operand.vmem [shape: s32[64,1], index: 0, kind: input, shape index: {}]   ;;  %s497_s1 = inlined_call_operand.vmem [shape: f32[64,1], index: 1, kind: input, shape index: {}]   ;;  %s498_s2 = inlined_call_operand.vmem [shape: f32[32,96], index: 2, kind: input, shape index: {}]   ;;  %s499_s3 = inlined_call_operand.vmem [shape: f32[1,96], index: 3, kind: input, shape index: {}]   ;;  %s500_s4 = inlined_call_operand.hbm [shape: f32[64,96], index: 4, kind: output, shape index: {}]  }
   0x1   :  { %v19_v0 = vld [vmem:[%s496_s0 + $0x8] sm:$0xff]  ;;  %v18_v1 = vld [vmem:[%s496_s0] sm:$0xff]  ;;  %361 = vset.pattern.permute.xlu1 %v384_v2  ;;  %360 = vset.pattern.permute.xlu0 %v384_v2  ;;  %v79_v5 = vld [vmem:[%s498_s2 + $0x18] sm:$0xff] }
   0x2   :  { %32 = vperm.xlu1 %361, %v19_v0   ;;  %29 = vperm.xlu0 %360, %v18_v1   ;;  %v23_v3 = vld [vmem:[%s496_s0 + $0x28] sm:$0xff]  ;;  %v22_v4 = vld [vmem:[%s496_s0 + $0x20] sm:$0xff]  ;;  %v78_v6 = vld [vmem:[%s498_s2 + $0x10] sm:$0xff] }
   0x6   :  { %44 = vperm.xlu1 %361, %v23_v3   ;;  %41 = vperm.xlu0 %360, %v22_v4  }
   0x7   :  { %9 = vsyncpa [#allocation3], 0  ;;  %v24_v7 = vld [vmem:[%s496_s0 + $0x30] sm:$0xff]  ;;  %327 = vmatprep.subr.mxu0 %v79_v5  ;;  %347 = vmatprep.subr.mxu1 %v79_v5  ;;  %v77_v9 = vld [vmem:[%s498_s2 + $0x8] sm:$0xff]  ;;  %v26_v21 = vlaneseq  ;;  %vm143_vm0 = vcmask 261120   ;;  %v385_v25 = vmov 0.0  }
   0x8   :  { %v20_v8 = vld [vmem:[%s496_s0 + $0x10] sm:$0xff]  ;;  %328 = vmatpush3.msra.mxu0 %v79_v5  ;;  %351 = vmatpush3.msra.mxu1 %v79_v5  ;;  %v25_v10 = vld [vmem:[%s496_s0 + $0x38] sm:$0xff]  ;;  %v76_v12 = vld [vmem:[%s498_s2] sm:$0xff]  ;;  %vm273_vm9 = vcmask 785408  }
   0x9   :  { %329 = vmatprep.subr.mxu0 %v78_v6  ;;  %348 = vmatprep.subr.mxu1 %v78_v6  ;;  %v21_v11 = vld [vmem:[%s496_s0 + $0x18] sm:$0xff]  ;;  %v81_v13 = vld [vmem:[%s497_s1 + $0x8] sm:$0xff]  ;;  %v80_v14 = vld [vmem:[%s497_s1] sm:$0xff]  ;;  %v27_v22 = vand.u32 127, %v26_v21 }
   0xa   :  { %47 = vperm.xlu1 %361, %v24_v7   ;;  %35 = vperm.xlu0 %360, %v20_v8   ;;  %v83_v15 = vld [vmem:[%s497_s1 + $0x18] sm:$0xff]  ;;  %v82_v16 = vld [vmem:[%s497_s1 + $0x10] sm:$0xff]  ;;  %v85_v17 = vld [vmem:[%s497_s1 + $0x28] sm:$0xff] }
   0xb   :  { %330 = vmatpush3.msra.mxu0 %v78_v6  ;;  %352 = vmatpush3.msra.mxu1 %v78_v6  ;;  %v84_v18 = vld [vmem:[%s497_s1 + $0x20] sm:$0xff]  ;;  %v87_v19 = vld [vmem:[%s497_s1 + $0x38] sm:$0xff]  ;;  %v86_v20 = vld [vmem:[%s497_s1 + $0x30] sm:$0xff] }
   0xc   :  { %331 = vmatprep.subr.mxu0 %v77_v9  ;;  %349 = vmatprep.subr.mxu1 %v77_v9  ;;  %v306_v43 = vld [vmem:[%s499_s3] ss:$0 sm:$0xff]  ;;  %s386_s3 = smov [#allocation2]  }
   0xd   :  { %332 = vmatpush3.msra.mxu0 %v77_v9  ;;  %353 = vmatpush3.msra.mxu1 %v77_v9  ;;  %s287_s28 = sshll.u32 %s386_s3, 4  ;;  %s288_s28 = int_to_ptr.vmem [resolvable:$true] %s287_s28 }
   0xe   :  { %50 = vperm.xlu1 %361, %v25_v10   ;;  %38 = vperm.xlu0 %360, %v21_v11   ;;  %s362_s29 = scalar_lea.vmem %s288_s28, 1024  ;;  %p367_p1 = scmp.lt.s32.totalorder %s288_s28, %s288_s28 }
   0xf   :  { %333 = vmatprep.subr.mxu0 %v76_v12  ;;  %350 = vmatprep.subr.mxu1 %v76_v12  ;;  %p363_p0 = scmp.ne.s32.totalorder %s288_s28, %s362_s29  ;;  %p368_p2 = scmp.lt.s32.totalorder %s362_s29, %s362_s29 }
  0x10   :  { %334 = vmatpush3.msra.mxu0 %v76_v12  ;;  %354 = vmatpush3.msra.mxu1 %v76_v12 }
  0x11   :  { %p369_p3 = por %p368_p2, %p367_p1 }
  0x12   :  { %96 = vperm.xlu1 %361, %v81_v13   ;;  %91 = vperm.xlu0 %360, %v80_v14  }
  0x13   :  { %p370_p4 = pnand %p369_p3, %p363_p0 }
  0x16   :  { %106 = vperm.xlu1 %361, %v83_v15   ;;  %101 = vperm.xlu0 %360, %v82_v16  }
  0x1a   :  { %116 = vperm.xlu1 %361, %v85_v17   ;;  %111 = vperm.xlu0 %360, %v84_v18  }
  0x1e   :  { %126 = vperm.xlu1 %361, %v87_v19   ;;  %121 = vperm.xlu0 %360, %v86_v20  }
  0x7d   :  { %v33_v23 = vpop.permute.xlu1 %32  ;;  %v30_v24 = vpop.permute.xlu0 %29 }
  0x7e   :  { %vm53_vm1 = vcmp.eq.s32.totalorder %v27_v22, %v33_v23  ;;  %vm52_vm2 = vcmp.eq.s32.totalorder %v27_v22, %v30_v24 }
  0x7f   :  { %v299_v26 = vsel %vm53_vm1, 1.0, %v385_v25  ;;  %v298_v27 = vsel %vm52_vm2, 1.0, %v385_v25 }
  0x80   :  { %335 = vmatprep.mubr.msk.f32.mxu0 %vm143_vm0, %v298_v27 }
  0x81   :  { %v45_v28 = vpop.permute.xlu1 %44  ;;  %336 = vmatmul.mubr.msk.f32.vlgmr.msra.gmra.mxu0 %vm143_vm0, %v299_v26  ;;  %v42_v29 = vpop.permute.xlu0 %41 }
  0x82   :  { %vm57_vm3 = vcmp.eq.s32.totalorder %v27_v22, %v45_v28  ;;  %vm56_vm4 = vcmp.eq.s32.totalorder %v27_v22, %v42_v29 }
  0x83   :  { %v303_v30 = vsel %vm57_vm3, 1.0, %v385_v25  ;;  %v302_v31 = vsel %vm56_vm4, 1.0, %v385_v25 }
  0x84   :  { %341 = vmatprep.mubr.msk.f32.mxu1 %vm143_vm0, %v302_v31 }
  0x85   :  { %v48_v32 = vpop.permute.xlu1 %47  ;;  %342 = vmatmul.mubr.msk.f32.vlgmr.msra.gmra.mxu1 %vm143_vm0, %v303_v30  ;;  %v36_v33 = vpop.permute.xlu0 %35 }
  0x86   :  { %vm58_vm5 = vcmp.eq.s32.totalorder %v27_v22, %v48_v32  ;;  %vm54_vm6 = vcmp.eq.s32.totalorder %v27_v22, %v36_v33 }
  0x87   :  { %v304_v34 = vsel %vm58_vm5, 1.0, %v385_v25  ;;  %v300_v35 = vsel %vm54_vm6, 1.0, %v385_v25 }
  0x88   :  { %338 = vmatprep.mubr.msk.f32.mxu0 %vm143_vm0, %v300_v35  ;;  %344 = vmatprep.mubr.msk.f32.mxu1 %vm143_vm0, %v304_v34 }
  0x89   :  { %v51_v36 = vpop.permute.xlu1 %50  ;;  %v39_v37 = vpop.permute.xlu0 %38 }
  0x8a   :  { %vm59_vm7 = vcmp.eq.s32.totalorder %v27_v22, %v51_v36  ;;  %vm55_vm8 = vcmp.eq.s32.totalorder %v27_v22, %v39_v37 }
  0x8b   :  { %v305_v38 = vsel %vm59_vm7, 1.0, %v385_v25  ;;  %v301_v39 = vsel %vm55_vm8, 1.0, %v385_v25 }
  0x8c   :  { %339 = vmatmul.mubr.msk.f32.gmra.mxu0 %vm143_vm0, %v301_v39  ;;  %345 = vmatmul.mubr.msk.f32.gmra.mxu1 %vm143_vm0, %v305_v38 }
  0x8d   :  { %v97_v40 = vpop.permute.xlu1 %96  ;;  %v92_v41 = vpop.permute.xlu0 %91 }
  0x8e   :  { %v136_v45 = vmul.f32 %v306_v43, %v97_v40  ;;  %v135_v48 = vmul.f32 %v306_v43, %v92_v41 }
  0x91   :  { %v107_v42 = vpop.permute.xlu1 %106  ;;  %v102_v44 = vpop.permute.xlu0 %101 }
  0x92   :  { %v138_v61 = vmul.f32 %v306_v43, %v107_v42  ;;  %v137_v1 = vmul.f32 %v306_v43, %v102_v44 }
  0x95   :  { %v117_v46 = vpop.permute.xlu1 %116  ;;  %v112_v50 = vpop.permute.xlu0 %111 }
  0x96   :  { %v140_v52 = vmul.f32 %v306_v43, %v117_v46  ;;  %v139_v55 = vmul.f32 %v306_v43, %v112_v50 }
  0x99   :  { %v127_v58 = vpop.permute.xlu1 %126  ;;  %v122_v60 = vpop.permute.xlu0 %121 }
  0x9a   :  { %v142_v62 = vmul.f32 %v306_v43, %v127_v58  ;;  %v141_v2 = vmul.f32 %v306_v43, %v122_v60 }
 0x141   :  { %v337_v47 = vpop.f32.mrf.mxu0 }
 0x142   :  { %v240_v49 = vadd.f32 %v337_v47, %v136_v45 }
 0x143   :  { %v234_v51 = vpop.f32.mrf.mxu0 }
 0x144   :  { %275 = vst.msk [vmem:[#allocation2 + $0x8] sm:$0xff] %vm273_vm9, %v240_v49  ;;  %v235_v53 = vadd.f32 %v234_v51, %v135_v48 }
 0x145   :  { %v343_v54 = vpop.f32.mrf.mxu1 }
 0x146   :  { %274 = vst.msk [vmem:[#allocation2] sm:$0xff] %vm273_vm9, %v235_v53  ;;  %v260_v56 = vadd.f32 %v343_v54, %v140_v52 }
 0x147   :  { %v254_v57 = vpop.f32.mrf.mxu1 }
 0x148   :  { %279 = vst.msk [vmem:[#allocation2 + $0x28] sm:$0xff] %vm273_vm9, %v260_v56  ;;  %v255_v59 = vadd.f32 %v254_v57, %v139_v55 }
 0x14a   :  { %278 = vst.msk [vmem:[#allocation2 + $0x20] sm:$0xff] %vm273_vm9, %v255_v59 }
 0x14c   :  { %v340_v63 = vpop.f32.mrf.mxu0  ;;  %v346_v0 = vpop.f32.mrf.mxu1 }
 0x14d   :  { %v250_v3 = vadd.f32 %v340_v63, %v138_v61  ;;  %v270_v4 = vadd.f32 %v346_v0, %v142_v62 }
 0x14e   :  { %v244_v5 = vpop.f32.mrf.mxu0  ;;  %v264_v6 = vpop.f32.mrf.mxu1 }
 0x14f   :  { %277 = vst.msk [vmem:[#allocation2 + $0x18] sm:$0xff] %vm273_vm9, %v250_v3  ;;  %281 = vst.msk [vmem:[#allocation2 + $0x38] sm:$0xff] %vm273_vm9, %v270_v4  ;;  %v245_v7 = vadd.f32 %v244_v5, %v137_v1  ;;  %v265_v8 = vadd.f32 %v264_v6, %v141_v2 }
 0x151   :  { %276 = vst.msk [vmem:[#allocation2 + $0x10] sm:$0xff] %vm273_vm9, %v245_v7  ;;  %280 = vst.msk [vmem:[#allocation2 + $0x30] sm:$0xff] %vm273_vm9, %v265_v8 }
 0x152   :  { %373 = shalt.err (!%p370_p4)
}
 0x153   :  { %s387_s30 = smov 128   ;;  %s388_s5 = smov 8  }
 0x154   :  { %293 = dma.vmem_to_hbm [thread:$0]  %s288_s28, 1024, %s500_s4, [#allocation3], %s387_s30, %s387_s30, %s388_s5  }
 0x155   :  { %382 = dma.done.wait [#allocation3], 1024  }
 0x156   :  { %383 = vsyncadd [#allocation3], 4294966272 }
 0x157   :  { %297 = vsyncpa [#allocation3], 1 }

</bundles_post_ra>
